<compile_context>
chip_gen: v7x
topology: tpu7x:2x2x1
jax: 0.10.0
libtpu: 0.0.40
codegen_flags: <defaults>
</compile_context>

<pallas_src>
import functools
import math

import jax
import jax.numpy as jnp
from jax import lax
from jax.experimental import pallas as pl
from jax.experimental.pallas import tpu as pltpu

_LN_EPS = 1e-5
_NEG_INF = -1e30  # finite sentinel keeps exp() NaN-free


def _layer_norm(x, gamma, beta):
    mu = jnp.mean(x, axis=-1, keepdims=True)
    var = jnp.mean((x - mu) ** 2, axis=-1, keepdims=True)
    return (x - mu) * lax.rsqrt(var + _LN_EPS) * gamma + beta


def _gelu_tanh(x):
    c = math.sqrt(2.0 / math.pi)
    return 0.5 * x * (1.0 + jnp.tanh(c * (x + 0.044715 * x * x * x)))


# --------------------------------------------------------------------------
# Kernel 1: LN1 + fused QKV projection -> head-major bf16 (B, H, T, dh)
# --------------------------------------------------------------------------
def qkv_proj_kernel(x_ref, g_ref, b_ref, wqkv_ref, q_ref, k_ref, v_ref,
                    *, n_heads, d_head):
    D = n_heads * d_head
    tp = x_ref.shape[1]
    scale = float(d_head) ** (-0.5)

    x = x_ref[0].astype(jnp.float32)                              # (tp, D)
    xn = _layer_norm(x, g_ref[0], b_ref[0]).astype(jnp.bfloat16)
    qkv = jnp.dot(xn, wqkv_ref[...], preferred_element_type=jnp.float32)

    def heads(t):                                                 # (tp,D)->(H,tp,dh)
        return jnp.transpose(t.reshape(tp, n_heads, d_head),
                             (1, 0, 2)).astype(jnp.bfloat16)

    q_ref[0] = heads(qkv[:, :D] * scale)      # fold 1/sqrt(dh) into q once
    k_ref[0] = heads(qkv[:, D:2 * D])
    v_ref[0] = heads(qkv[:, 2 * D:])


# --------------------------------------------------------------------------
# Kernel 2: flash attention over a triangular (q-tile, kv-tile) grid
# --------------------------------------------------------------------------
def flash_attn_kernel(qi_tbl, ki_tbl, q_ref, k_ref, v_ref, o_ref,
                      m_scr, l_scr, acc_scr, *, n_heads, d_head):
    t = pl.program_id(1)
    qi = qi_tbl[t]
    ki = ki_tbl[t]
    blk_q = q_ref.shape[2]
    blk_k = k_ref.shape[2]

    @pl.when(ki == 0)
    def _init():
        m_scr[...] = jnp.full(m_scr.shape, _NEG_INF, m_scr.dtype)
        l_scr[...] = jnp.zeros(l_scr.shape, l_scr.dtype)
        acc_scr[...] = jnp.zeros(acc_scr.shape, acc_scr.dtype)

    def _update(apply_mask):
        qh = q_ref[0]                                             # (H,tq,dh) bf16
        kh = k_ref[0]                                             # (H,tk,dh) bf16
        vh = v_ref[0]
        s = jnp.einsum('htd,hsd->hts', qh, kh,
                       preferred_element_type=jnp.float32)        # (H,tq,tk)
        if apply_mask:
            # only the diagonal tile straddles the causal boundary; local
            # row/col offsets cancel because q_start == kv_start there.
            row = lax.broadcasted_iota(jnp.int32, (1, blk_q, blk_k), 1)
            col = lax.broadcasted_iota(jnp.int32, (1, blk_q, blk_k), 2)
            s = jnp.where(row >= col, s, _NEG_INF)
        m_prev = m_scr[...]
        m_new = jnp.maximum(m_prev, jnp.max(s, axis=-1, keepdims=True))
        alpha = jnp.exp(m_prev - m_new)
        p = jnp.exp(s - m_new)                                    # masked -> 0
        l_scr[...] = alpha * l_scr[...] + jnp.sum(p, axis=-1, keepdims=True)
        acc_scr[...] = alpha * acc_scr[...] + jnp.einsum(
            'hts,hsd->htd', p.astype(jnp.bfloat16), vh,
            preferred_element_type=jnp.float32)
        m_scr[...] = m_new

    @pl.when(ki == qi)          # diagonal tile: needs the causal mask
    def _():
        _update(apply_mask=True)

    @pl.when(ki != qi)          # interior tile: fully unmasked, no VPU mask work
    def _():
        _update(apply_mask=False)

    @pl.when(ki == qi)          # diagonal is also the last kv tile for this row
    def _finalize():
        inv_l = pl.reciprocal(l_scr[...], approx=True)            # EUP
        attn = acc_scr[...] * inv_l                               # (H,tq,dh)
        attn = jnp.transpose(attn, (1, 0, 2)).reshape(blk_q, n_heads * d_head)
        o_ref[0] = attn.astype(o_ref.dtype)


# --------------------------------------------------------------------------
# Kernel 3: z = x + attn, LN2, GELU FFW, final residual (adds original x)
# --------------------------------------------------------------------------
def ffw_kernel(x_ref, a_ref, g_ref, be_ref, w1_ref, b1_ref, w2_ref, b2_ref,
               o_ref):
    x = x_ref[0].astype(jnp.float32)                              # (tf, D)
    z = x + a_ref[0].astype(jnp.float32)
    zn = _layer_norm(z, g_ref[0], be_ref[0]).astype(jnp.bfloat16)
    h = jnp.dot(zn, w1_ref[...], preferred_element_type=jnp.float32) + b1_ref[0]
    h = _gelu_tanh(h).astype(jnp.bfloat16)
    f = jnp.dot(h, w2_ref[...], preferred_element_type=jnp.float32) + b2_ref[0]
    # PyTorch module: return x + dropout(ffw(ffw_prenorm(x + attn)))
    o_ref[0] = (x + f).astype(o_ref.dtype)


# --------------------------------------------------------------------------
# Wrapper
# --------------------------------------------------------------------------
def _vmem_limit(est_bytes):
    try:
        info = pltpu.get_tpu_info()
        cap = int(getattr(info, "vmem_capacity_bytes", 64 * 1024 * 1024))
    except Exception:
        cap = 64 * 1024 * 1024          # conservative (v7x) fallback
    want = max(32 * 1024 * 1024, int(est_bytes) * 3 // 2)
    return int(min(want, cap * 3 // 4))


def attention_block(x, params, *, n_heads, block=None):
    """Pallas AttentionBlock.forward(x, mask=causal, cache=None), eval mode."""
    B, T, D = x.shape
    assert D % n_heads == 0
    dh = D // n_heads

    if block is None:
        if T <= 256:
            block = T
        elif T % 256 == 0:
            block = 256                 # fills the 256-wide MXU on v6e/v7x
        elif T % 128 == 0:
            block = 128                 # v5e-friendly / fallback
        else:
            raise ValueError(f"T={T} must be a multiple of 128 or <= 256")
    assert T % block == 0
    nt = T // block
    bf16, f32 = 2, 4

    def const2(shape):
        return pl.BlockSpec(shape, lambda b, i: (0, 0))

    # ---------------- kernel 1: QKV projection -----------------------------
    est1 = (2 * block * D * f32 + 2 * 3 * D * D * bf16
            + 2 * 3 * block * D * bf16 + 2 * block * 3 * D * f32 + 16 * D * f32)
    q, k, v = pl.pallas_call(
        functools.partial(qkv_proj_kernel, n_heads=n_heads, d_head=dh),
        out_shape=[jax.ShapeDtypeStruct((B, n_heads, T, dh), jnp.bfloat16)] * 3,
        grid=(B, nt),
        in_specs=[
            pl.BlockSpec((1, block, D), lambda b, i: (b, i, 0)),
            const2((1, D)), const2((1, D)),
            const2((D, 3 * D)),
        ],
        out_specs=[pl.BlockSpec((1, n_heads, block, dh),
                                lambda b, i: (b, 0, i, 0))] * 3,
        compiler_params=pltpu.CompilerParams(
            dimension_semantics=("parallel", "parallel"),
            vmem_limit_bytes=_vmem_limit(est1)),
    )(x, params["ln1_g"], params["ln1_b"], params["wqkv"])

    # ---------------- kernel 2: flash attention (triangular grid) ----------
    tri = [(qi, ki) for qi in range(nt) for ki in range(qi + 1)]
    qi_tbl = jnp.asarray([p[0] for p in tri], jnp.int32)
    ki_tbl = jnp.asarray([p[1] for p in tri], jnp.int32)
    ntri = len(tri)

    est2 = (2 * 3 * block * D * bf16 + 2 * block * D * bf16
            + block * D * f32 + 2 * n_heads * block * f32
            + 3 * n_heads * block * block * f32)
    attn = pl.pallas_call(
        functools.partial(flash_attn_kernel, n_heads=n_heads, d_head=dh),
        out_shape=jax.ShapeDtypeStruct((B, T, D), jnp.bfloat16),
        grid_spec=pltpu.PrefetchScalarGridSpec(
            num_scalar_prefetch=2,
            grid=(B, ntri),
            in_specs=[
                pl.BlockSpec((1, n_heads, block, dh),
                             lambda b, t, qt, kt: (b, 0, qt[t], 0)),
                pl.BlockSpec((1, n_heads, block, dh),
                             lambda b, t, qt, kt: (b, 0, kt[t], 0)),
                pl.BlockSpec((1, n_heads, block, dh),
                             lambda b, t, qt, kt: (b, 0, kt[t], 0)),
            ],
            out_specs=pl.BlockSpec((1, block, D),
                                   lambda b, t, qt, kt: (b, qt[t], 0)),
            scratch_shapes=[
                pltpu.VMEM((n_heads, block, 1), jnp.float32),   # running max
                pltpu.VMEM((n_heads, block, 1), jnp.float32),   # running sum
                pltpu.VMEM((n_heads, block, dh), jnp.float32),  # accumulator
            ]),
        compiler_params=pltpu.CompilerParams(
            dimension_semantics=("parallel", "arbitrary"),
            vmem_limit_bytes=_vmem_limit(est2)),
    )(qi_tbl, ki_tbl, q, k, v)

    # ---------------- kernel 3: FFW + residuals ----------------------------
    est3 = (2 * block * D * (f32 + bf16) + 2 * 8 * D * D * bf16
            + 2 * block * D * f32 + 2 * block * 4 * D * f32 + 16 * D * f32)
    out = pl.pallas_call(
        ffw_kernel,
        out_shape=jax.ShapeDtypeStruct((B, T, D), jnp.float32),
        grid=(B, nt),
        in_specs=[
            pl.BlockSpec((1, block, D), lambda b, i: (b, i, 0)),   # x
            pl.BlockSpec((1, block, D), lambda b, i: (b, i, 0)),   # attn
            const2((1, D)), const2((1, D)),                        # ln2 g/b
            const2((D, 4 * D)), const2((1, 4 * D)),                # w1, b1
            const2((4 * D, D)), const2((1, D)),                    # w2, b2
        ],
        out_specs=pl.BlockSpec((1, block, D), lambda b, i: (b, i, 0)),
        compiler_params=pltpu.CompilerParams(
            dimension_semantics=("parallel", "parallel"),
            vmem_limit_bytes=_vmem_limit(est3)),
    )(x, attn, params["ln2_g"], params["ln2_b"],
      params["w1"], params["b1"], params["w2"], params["b2"])

    # forward() returns (output, cache); no-cache path only.
    return out, None


# --------------------------------------------------------------------------
# Params + pure-JAX reference (matches the PyTorch forward, eval/causal/no-cache)
# --------------------------------------------------------------------------
def init_params(key, d_model):
    D = d_model
    ks = jax.random.split(key, 5)
    s = 0.02
    wq = s * jax.random.normal(ks[0], (D, D), jnp.float32)
    wk = s * jax.random.normal(ks[1], (D, D), jnp.float32)
    wv = s * jax.random.normal(ks[2], (D, D), jnp.float32)
    return dict(
        ln1_g=jnp.ones((1, D), jnp.float32),
        ln1_b=jnp.zeros((1, D), jnp.float32),
        ln2_g=jnp.ones((1, D), jnp.float32),
        ln2_b=jnp.zeros((1, D), jnp.float32),
        wqkv=jnp.concatenate([wq, wk, wv], axis=1).astype(jnp.bfloat16),
        w1=(s * jax.random.normal(ks[3], (D, 4 * D), jnp.float32)).astype(jnp.bfloat16),
        b1=jnp.zeros((1, 4 * D), jnp.float32),
        w2=(s * jax.random.normal(ks[4], (4 * D, D), jnp.float32)).astype(jnp.bfloat16),
        b2=jnp.zeros((1, D), jnp.float32),
    )


def reference_forward(x, params, n_heads):
    B, T, D = x.shape
    dh = D // n_heads

    def ln(v, g, b):
        mu = jnp.mean(v, -1, keepdims=True)
        var = jnp.mean((v - mu) ** 2, -1, keepdims=True)
        return (v - mu) * lax.rsqrt(var + _LN_EPS) * g + b

    wqkv = params["wqkv"].astype(jnp.float32)
    xn = ln(x, params["ln1_g"][0], params["ln1_b"][0])
    qkv = xn @ wqkv
    q, k, v = qkv[..., :D], qkv[..., D:2 * D], qkv[..., 2 * D:]

    def split(t):
        return t.reshape(B, T, n_heads, dh).transpose(0, 2, 1, 3)

    qh, kh, vh = split(q), split(k), split(v)
    logits = jnp.einsum('bhtd,bhsd->bhts', qh, kh) * dh ** (-0.5)
    mask = jnp.tril(jnp.ones((T, T), bool))
    logits = jnp.where(mask, logits, _NEG_INF)
    p = jax.nn.softmax(logits, axis=-1)
    attn = jnp.einsum('bhts,bhsd->bhtd', p, vh).transpose(0, 2, 1, 3).reshape(B, T, D)
    z = x + attn
    zn = ln(z, params["ln2_g"][0], params["ln2_b"][0])
    h = _gelu_tanh(zn @ params["w1"].astype(jnp.float32) + params["b1"][0])
    # Module adds the ORIGINAL x in the final residual.
    return x + (h @ params["w2"].astype(jnp.float32) + params["b2"][0])


if __name__ == "__main__":
    B, T, D, H = 2, 8, 32, 4          # batch, seq, d_model, n_heads (d_head=8)
    key = jax.random.PRNGKey(0)
    kx, kp = jax.random.split(key)

    x = jax.random.normal(kx, (B, T, D), jnp.float32)
    params = init_params(kp, D)

    out, cache = attention_block(x, params, n_heads=H)
    out = jax.block_until_ready(out)

    assert out.shape == (B, T, D) and out.dtype == jnp.float32
    assert bool(jnp.all(jnp.isfinite(out)))

    ref = reference_forward(x, params, H)
    err = float(jnp.max(jnp.abs(out - ref)))
    assert bool(jnp.allclose(out, ref, atol=5e-2, rtol=5e-2)), err
    print("KERNEL_OK")
</pallas_src>

<mosaic_0001>
module attributes {stable_mosaic.version = 11 : i64} {
  func.func @qkv_proj_kernel(%arg0: i32, %arg1: i32, %arg2: memref<1x8x32xf32, #tpu.memory_space<vmem>>, %arg3: memref<1x32xf32, #tpu.memory_space<vmem>>, %arg4: memref<1x32xf32, #tpu.memory_space<vmem>>, %arg5: memref<32x96xbf16, #tpu.memory_space<vmem>>, %arg6: memref<1x4x8x8xbf16, #tpu.memory_space<vmem>>, %arg7: memref<1x4x8x8xbf16, #tpu.memory_space<vmem>>, %arg8: memref<1x4x8x8xbf16, #tpu.memory_space<vmem>>) attributes {dimension_semantics = [#tpu.dimension_semantics<parallel>, #tpu.dimension_semantics<parallel>], iteration_bounds = array<i64: 2, 1>, scalar_prefetch = 0 : i64, scratch_operands = 0 : i64, tpu.core_type = #tpu.core_type<tc>, window_params = [{transform_indices = @transform_0, window_bounds = array<i64: 1, 8, 32>}, {pipeline_mode = #tpu.pipeline_mode<synchronous>, transform_indices = @transform_1, window_bounds = array<i64: 1, 32>}, {pipeline_mode = #tpu.pipeline_mode<synchronous>, transform_indices = @transform_2, window_bounds = array<i64: 1, 32>}, {pipeline_mode = #tpu.pipeline_mode<synchronous>, transform_indices = @transform_3, window_bounds = array<i64: 32, 96>}, {transform_indices = @transform_4, window_bounds = array<i64: 1, 4, 8, 8>}, {transform_indices = @transform_5, window_bounds = array<i64: 1, 4, 8, 8>}, {transform_indices = @transform_6, window_bounds = array<i64: 1, 4, 8, 8>}]} {
    %c0 = arith.constant 0 : index
    %c0_0 = arith.constant 0 : index
    %c0_1 = arith.constant 0 : index
    %0 = vector.load %arg2[%c0, %c0_0, %c0_1] : memref<1x8x32xf32, #tpu.memory_space<vmem>>, vector<1x8x32xf32>
    %1 = vector.shape_cast %0 : vector<1x8x32xf32> to vector<8x32xf32>
    %c0_2 = arith.constant 0 : index
    %c0_3 = arith.constant 0 : index
    %2 = vector.load %arg3[%c0_2, %c0_3] : memref<1x32xf32, #tpu.memory_space<vmem>>, vector<1x32xf32>
    %3 = vector.shape_cast %2 : vector<1x32xf32> to vector<32xf32>
    %c0_4 = arith.constant 0 : index
    %c0_5 = arith.constant 0 : index
    %4 = vector.load %arg4[%c0_4, %c0_5] : memref<1x32xf32, #tpu.memory_space<vmem>>, vector<1x32xf32>
    %5 = vector.shape_cast %4 : vector<1x32xf32> to vector<32xf32>
    %cst = arith.constant dense<0.000000e+00> : vector<8xf32>
    %6 = vector.multi_reduction <add>, %1, %cst [1] : vector<8x32xf32> to vector<8xf32>
    %7 = vector.shape_cast %6 : vector<8xf32> to vector<8x1xf32>
    %cst_6 = arith.constant 3.200000e+01 : f32
    %8 = vector.broadcast %cst_6 : f32 to vector<8x1xf32>
    %9 = arith.divf %7, %8 : vector<8x1xf32>
    %10 = vector.broadcast %9 : vector<8x1xf32> to vector<8x32xf32>
    %11 = arith.subf %1, %10 : vector<8x32xf32>
    %12 = arith.mulf %11, %11 : vector<8x32xf32>
    %cst_7 = arith.constant dense<0.000000e+00> : vector<8xf32>
    %13 = vector.multi_reduction <add>, %12, %cst_7 [1] : vector<8x32xf32> to vector<8xf32>
    %14 = vector.shape_cast %13 : vector<8xf32> to vector<8x1xf32>
    %cst_8 = arith.constant 3.200000e+01 : f32
    %15 = vector.broadcast %cst_8 : f32 to vector<8x1xf32>
    %16 = arith.divf %14, %15 : vector<8x1xf32>
    %17 = vector.broadcast %9 : vector<8x1xf32> to vector<8x32xf32>
    %18 = arith.subf %1, %17 : vector<8x32xf32>
    %cst_9 = arith.constant 9.99999974E-6 : f32
    %19 = vector.broadcast %cst_9 : f32 to vector<8x1xf32>
    %20 = arith.addf %16, %19 : vector<8x1xf32>
    %21 = math.rsqrt %20 : vector<8x1xf32>
    %22 = vector.broadcast %21 : vector<8x1xf32> to vector<8x32xf32>
    %23 = arith.mulf %18, %22 : vector<8x32xf32>
    %24 = vector.shape_cast %3 : vector<32xf32> to vector<1x32xf32>
    %25 = vector.broadcast %24 : vector<1x32xf32> to vector<8x32xf32>
    %26 = arith.mulf %23, %25 : vector<8x32xf32>
    %27 = vector.shape_cast %5 : vector<32xf32> to vector<1x32xf32>
    %28 = vector.broadcast %27 : vector<1x32xf32> to vector<8x32xf32>
    %29 = arith.addf %26, %28 : vector<8x32xf32>
    %30 = arith.truncf %29 : vector<8x32xf32> to vector<8x32xbf16>
    %c0_10 = arith.constant 0 : index
    %c0_11 = arith.constant 0 : index
    %31 = vector.load %arg5[%c0_10, %c0_11] : memref<32x96xbf16, #tpu.memory_space<vmem>>, vector<32x96xbf16>
    %cst_12 = arith.constant dense<0.000000e+00> : vector<8x96xf32>
    %32 = tpu.matmul %30, %31, %cst_12 {dimension_numbers = #tpu.dot_dimension_numbers<[1], [0], [0], [1], [0, 0, 1, 1], [], []>} : vector<8x32xbf16>, vector<32x96xbf16>, vector<8x96xf32> -> vector<8x96xf32>
    %33 = vector.extract_strided_slice %32 {offsets = [0, 0], sizes = [8, 32], strides = [1, 1]} : vector<8x96xf32> to vector<8x32xf32>
    %cst_13 = arith.constant 0.353553385 : f32
    %34 = vector.broadcast %cst_13 : f32 to vector<8x32xf32>
    %35 = arith.mulf %33, %34 : vector<8x32xf32>
    %36 = vector.shape_cast %35 : vector<8x32xf32> to vector<8x4x8xf32>
    %37 = tpu.transpose %36, [1, 0, 2] : vector<8x4x8xf32> -> vector<4x8x8xf32>
    %38 = arith.truncf %37 : vector<4x8x8xf32> to vector<4x8x8xbf16>
    %c0_14 = arith.constant 0 : index
    %c0_15 = arith.constant 0 : index
    %c0_16 = arith.constant 0 : index
    %c0_17 = arith.constant 0 : index
    %39 = vector.load %arg6[%c0_14, %c0_15, %c0_16, %c0_17] : memref<1x4x8x8xbf16, #tpu.memory_space<vmem>>, vector<1x4x8x8xbf16>
    %40 = vector.shape_cast %39 : vector<1x4x8x8xbf16> to vector<4x8x8xbf16>
    %41 = vector.shape_cast %38 : vector<4x8x8xbf16> to vector<1x4x8x8xbf16>
    tpu.vector_store %arg6[%c0_14, %c0_15, %c0_16, %c0_17], %41 {strides = array<i32>} : memref<1x4x8x8xbf16, #tpu.memory_space<vmem>>, vector<1x4x8x8xbf16>,
    %42 = vector.extract_strided_slice %32 {offsets = [0, 32], sizes = [8, 32], strides = [1, 1]} : vector<8x96xf32> to vector<8x32xf32>
    %43 = vector.shape_cast %42 : vector<8x32xf32> to vector<8x4x8xf32>
    %44 = tpu.transpose %43, [1, 0, 2] : vector<8x4x8xf32> -> vector<4x8x8xf32>
    %45 = arith.truncf %44 : vector<4x8x8xf32> to vector<4x8x8xbf16>
    %c0_18 = arith.constant 0 : index
    %c0_19 = arith.constant 0 : index
    %c0_20 = arith.constant 0 : index
    %c0_21 = arith.constant 0 : index
    %46 = vector.load %arg7[%c0_18, %c0_19, %c0_20, %c0_21] : memref<1x4x8x8xbf16, #tpu.memory_space<vmem>>, vector<1x4x8x8xbf16>
    %47 = vector.shape_cast %46 : vector<1x4x8x8xbf16> to vector<4x8x8xbf16>
    %48 = vector.shape_cast %45 : vector<4x8x8xbf16> to vector<1x4x8x8xbf16>
    tpu.vector_store %arg7[%c0_18, %c0_19, %c0_20, %c0_21], %48 {strides = array<i32>} : memref<1x4x8x8xbf16, #tpu.memory_space<vmem>>, vector<1x4x8x8xbf16>,
    %49 = vector.extract_strided_slice %32 {offsets = [0, 64], sizes = [8, 32], strides = [1, 1]} : vector<8x96xf32> to vector<8x32xf32>
    %50 = vector.shape_cast %49 : vector<8x32xf32> to vector<8x4x8xf32>
    %51 = tpu.transpose %50, [1, 0, 2] : vector<8x4x8xf32> -> vector<4x8x8xf32>
    %52 = arith.truncf %51 : vector<4x8x8xf32> to vector<4x8x8xbf16>
    %c0_22 = arith.constant 0 : index
    %c0_23 = arith.constant 0 : index
    %c0_24 = arith.constant 0 : index
    %c0_25 = arith.constant 0 : index
    %53 = vector.load %arg8[%c0_22, %c0_23, %c0_24, %c0_25] : memref<1x4x8x8xbf16, #tpu.memory_space<vmem>>, vector<1x4x8x8xbf16>
    %54 = vector.shape_cast %53 : vector<1x4x8x8xbf16> to vector<4x8x8xbf16>
    %55 = vector.shape_cast %52 : vector<4x8x8xbf16> to vector<1x4x8x8xbf16>
    tpu.vector_store %arg8[%c0_22, %c0_23, %c0_24, %c0_25], %55 {strides = array<i32>} : memref<1x4x8x8xbf16, #tpu.memory_space<vmem>>, vector<1x4x8x8xbf16>,
    return
  }
  func.func @transform_0(%arg0: i32, %arg1: i32) -> (i32, i32, i32) {
    %c0_i32 = arith.constant 0 : i32
    %c0_i32_0 = arith.constant 0 : i32
    return %arg0, %arg1, %c0_i32 : i32, i32, i32
  }
  func.func @transform_1(%arg0: i32, %arg1: i32) -> (i32, i32) {
    %c0_i32 = arith.constant 0 : i32
    %c0_i32_0 = arith.constant 0 : i32
    %c0_i32_1 = arith.constant 0 : i32
    return %c0_i32, %c0_i32_0 : i32, i32
  }
  func.func @transform_2(%arg0: i32, %arg1: i32) -> (i32, i32) {
    %c0_i32 = arith.constant 0 : i32
    %c0_i32_0 = arith.constant 0 : i32
    %c0_i32_1 = arith.constant 0 : i32
    return %c0_i32, %c0_i32_0 : i32, i32
  }
  func.func @transform_3(%arg0: i32, %arg1: i32) -> (i32, i32) {
    %c0_i32 = arith.constant 0 : i32
    %c0_i32_0 = arith.constant 0 : i32
    %c0_i32_1 = arith.constant 0 : i32
    return %c0_i32, %c0_i32_0 : i32, i32
  }
  func.func @transform_4(%arg0: i32, %arg1: i32) -> (i32, i32, i32, i32) {
    %c0_i32 = arith.constant 0 : i32
    %c0_i32_0 = arith.constant 0 : i32
    %c0_i32_1 = arith.constant 0 : i32
    return %arg0, %c0_i32, %arg1, %c0_i32_0 : i32, i32, i32, i32
  }
  func.func @transform_5(%arg0: i32, %arg1: i32) -> (i32, i32, i32, i32) {
    %c0_i32 = arith.constant 0 : i32
    %c0_i32_0 = arith.constant 0 : i32
    %c0_i32_1 = arith.constant 0 : i32
    return %arg0, %c0_i32, %arg1, %c0_i32_0 : i32, i32, i32, i32
  }
  func.func @transform_6(%arg0: i32, %arg1: i32) -> (i32, i32, i32, i32) {
    %c0_i32 = arith.constant 0 : i32
    %c0_i32_0 = arith.constant 0 : i32
    %c0_i32_1 = arith.constant 0 : i32
    return %arg0, %c0_i32, %arg1, %c0_i32_0 : i32, i32, i32, i32
  }
}

</mosaic_0001>

<bundles_post_ra>
// kernel: tpu_custom_call.1
= control target key start
LH: loop header
LB: loop body
LE: loop exit
PB: predicated region body
PF: predicated region fallthrough
CT: control target
= control target key end

     0   :  { %s1906_s0 = inlined_call_operand.hbm [shape: f32[2,8,32], index: 0, kind: input, shape index: {}]   ;;  %s1907_s1 = inlined_call_operand.vmem [shape: f32[1,32], index: 1, kind: input, shape index: {}]   ;;  %s1908_s2 = inlined_call_operand.vmem [shape: f32[1,32], index: 2, kind: input, shape index: {}]   ;;  %s1909_s3 = inlined_call_operand.hbm [shape: bf16[32,96], index: 3, kind: input, shape index: {}]   ;;  %s1910_s4 = inlined_call_operand.hbm [shape: bf16[2,4,8,8], index: 4, kind: output, shape index: {0}]   ;;  %s1911_s5 = inlined_call_operand.hbm [shape: bf16[2,4,8,8], index: 5, kind: output, shape index: {1}]   ;;  %s1912_s6 = inlined_call_operand.hbm [shape: bf16[2,4,8,8], index: 6, kind: output, shape index: {2}]  }
   0x1   :  { %1917 = sst [smem:[#allocation15_spill]] %s1909_s3 }
   0x2   :  { %12 = vsyncpa [#allocation3], 0 }
   0x3   :  { %14 = vsyncpa [#allocation3 + $0x1], 0 }
   0x4   :  { %15 = vsyncpa [#allocation6], 0 }
   0x5   :  { %16 = vsyncpa [#allocation4], 0 }
   0x6   :  { %18 = vsyncpa [#allocation4 + $0x1], 0 }
   0x7   :  { %19 = vsyncpa [#allocation9], 0 }
   0x8   :  { %21 = vsyncpa [#allocation9 + $0x1], 0  ;;  %s1513_s21 = smov 0   ;;  %s1515_s22 = smov 0  }
   0x9   :  { %s1517_s23 = smov 0   ;;  %s1519_s24 = smov 0  }
   0xa   :  { %s1521_s25 = smov 0   ;;  %s1523_s26 = smov 0  }
   0xb LB: > { %s1544_s27 = sadd.s32 4294967295, %s1459_s26   ;;  %s1916_s28 = sadd.s32 4294967294, %s1459_s26   ;;  %s1459_s26 = sphi %s1523_s26, %s27_s26   ;;  %s1455_s25 = sphi %s1521_s25, %s1938_s25   ;;  %s1451_s24 = sphi %s1519_s24, %s1937_s24   ;;  %s1447_s23 = sphi %s1517_s23, %s1936_s23   ;;  %s1443_s22 = sphi %s1515_s22, %s1935_s22   ;;  %s1439_s21 = sphi %s1513_s21, %s1934_s21  }
   0xc   : > { %p61_p0 = scmp.ne.s32.totalorder %s1443_s22, %s1439_s21  ;;  %p1913_p1 = scmp.eq.s32.totalorder %s1544_s27, 0 }
   0xd   : > { %p156_p3 = scmp.eq.s32.totalorder %s1916_s28, 1  ;;  %p1109_p5 = scmp.ge.s32.totalorder %s1459_s26, 1 }
   0xe   : > { %p1555_p4 = por %p1913_p1, %p61_p0  ;;  %p219_p7 = scmp.lt.s32.totalorder %s1459_s26, 3 }
   0xf   : > { %p1560_p6 = por %p156_p3, %p61_p0  ;;  %s1461_s8 = smov [#allocation5]  }
  0x10   : > { %s1918_s29 = scalar_select %p1555_p4, 1, 0 }
  0x11   : > { %s1919_s30 = scalar_select %p1560_p6, 1, 0 }
  0x12   : > { %p1565_p8 = pnand %p1109_p5, %p219_p7  ;;  %s237_s9 = sshll.u32 %s1461_s8, 4  ;;  %s238_s9 = int_to_ptr.vmem [resolvable:$true] %s237_s9 }
  0x13   : > { %s39_s11 = sadd.s32 1, %s1455_s25  ;;  %s1922_s3 = sld [smem:[#allocation15_spill]] }
  0x14   : > { %s1920_s7 = scalar_select %p1565_p8, 1, 0 }
  0x15   : > { %p1168_p9 = pneg %p1565_p8 }
  0x17   : > { %p1574_p11 = pnand %p1168_p9, %p1913_p1 }
  0x19   : > { %s1255_s14 = scalar_lea.hbm %s1922_s3, 256  ;;  %p1257_p13 = pneg %p1574_p11 }
  0x1a   : > { %p1256_p12 = scmp.ne.s32.totalorder %s1922_s3, %s1255_s14  ;;  %p1262_p5 = scmp.lt.u32.totalorder %s1255_s14, %s1922_s3 }
  0x1c   : > { %p1258_p0 = pnand %p1257_p13, %p1256_p12 }
  0x1e   : > { %p1259_p3 = pneg %p1258_p0 }
  0x20   : > { %p1264_p7 = pnand %p1262_p5, %p1259_p3 }
  0x22   : > { %1267 = shalt.err (!%p1264_p7)
}
  0x23   : > { %s1268_s19 = scalar_lea.vmem %s238_s9, 256  ;;  %p1276_p2 = scmp.lt.s32.totalorder %s238_s9, %s238_s9 }
  0x24   : > { %p1269_p9 = scmp.ne.s32.totalorder %s238_s9, %s1268_s19  ;;  %p1277_p6 = scmp.lt.s32.totalorder %s1268_s19, %s1268_s19 }
  0x26   : > { %p1271_p10 = pnand %p1269_p9, %p1257_p13  ;;  %p1278_p4 = por %p1277_p6, %p1276_p2 }
  0x28   : > { %p1272_p1 = pneg %p1271_p10 }
  0x2a   : > { %p1279_p8 = pnand %p1278_p4, %p1272_p1 }
  0x2c   : > { %1282 = shalt.err (!%p1279_p8)
}
  0x2d   : > { %s1462_s20 = smov 64   ;;  %s1463_s8 = smov 4  }
  0x2e   : > { %1171 = dma.hbm_to_vmem [thread:$0]  (!%p1574_p11), %s1922_s3, 256, %s238_s9, [#allocation6], %s1462_s20, %s1462_s20, %s1463_s8  }
  0x2f   : > { %p41_p1 = scmp.ge.s32.totalorder %s39_s11, 2  ;;  %s48_s14 = sadd.s32 1, %s1447_s23 }
  0x30   : > { %p55_p2 = scmp.ne.s32.totalorder %s1447_s23, %s1443_s22  ;;  %p56_p4 = scmp.eq.s32.totalorder %s1459_s26, 0 }
  0x31   : > { %s1940_s11 = smov (%p41_p1, %s39_s11), 0  ;;  %p1924_p8 = scmp.eq.s32.totalorder %s1544_s27, 1 }
  0x32   : > { %p1601_p6 = por %p56_p4, %p55_p2  ;;  %s43_s10 = ssub.s32 %s1455_s25, %s1940_s11 }
  0x33   : > { %p1607_p10 = por %p1924_p8, %p55_p2  ;;  %p1187_p12 = scmp.lt.s32.totalorder %s1459_s26, 2 }
  0x34   : > { %p46_p11 = scmp.eq.s32.totalorder %s43_s10, 0  ;;  %s251_s9 = sand.u32 1, %s1447_s23  }
  0x35   : > { %s1112_s17 = sshll.u32 %s251_s9, 3  ;;  %s1113_s19 = sshll.u32 %s1455_s25, 7 }
  0x36   : > { %s1616_s18 = scalar_select %p46_p11, %s1447_s23, %s48_s14  }
  0x37   : > { %s1622_s12 = scalar_lea.hbm %s1906_s0, %s1113_s19  ;;  %s255_s13 = scalar_lea.vmem [#allocation2], %s1112_s17 }
  0x38   : > { %s263_s28 = sshll.u32 %s255_s13, 4  ;;  %p1628_p13 = pnand %p1187_p12, %p1601_p6  ;;  %s1624_s28 = int_to_ptr.vmem [resolvable:$true] %s263_s28 }
  0x39   : > { %s252_s14 = scalar_lea.sflag [#allocation3], %s251_s9  ;;  %s1283_s3 = scalar_lea.hbm %s1622_s12, 128 }
  0x3a   : > { %p1284_p0 = scmp.ne.s32.totalorder %s1622_s12, %s1283_s3  ;;  %p1285_p3 = pneg %p1628_p13 }
  0x3b   : > { %s1288_s20 = scalar_lea.hbm %s1906_s0, 256  ;;  %p1289_p9 = scmp.lt.u32.totalorder %s1622_s12, %s1906_s0 }
  0x3c   : > { %p1286_p5 = pnand %p1285_p3, %p1284_p0  ;;  %p1290_p1 = scmp.lt.u32.totalorder %s1288_s20, %s1283_s3 }
  0x3d   : > { %p1292_p4 = scmp.lt.u32.totalorder %s1283_s3, %s1622_s12 }
  0x3e   : > { %p1287_p7 = pneg %p1286_p5  ;;  %p1291_p2 = por %p1290_p1, %p1289_p9 }
  0x40   : > { %p1293_p6 = por %p1292_p4, %p1291_p2 }
  0x42   : > { %p1294_p8 = pnand %p1293_p6, %p1287_p7 }
  0x44   : > { %1297 = shalt.err (!%p1294_p8)
}
  0x45   : > { %s1298_s9 = scalar_lea.vmem %s1624_s28, 128  ;;  %s1464_s13 = smov [#allocation2]  }
  0x46   : > { %p1299_p12 = scmp.ne.s32.totalorder %s1624_s28, %s1298_s9  ;;  %s1303_s17 = sshll.u32 %s1464_s13, 4  ;;  %s1304_s17 = int_to_ptr.vmem [resolvable:$false] %s1303_s17 }
  0x47   : > { %s1305_s19 = scalar_lea.vmem %s1304_s17, 256  ;;  %p1306_p5 = scmp.lt.s32.totalorder %s1624_s28, %s1304_s17 }
  0x48   : > { %p1301_p11 = pnand %p1299_p12, %p1285_p3  ;;  %p1307_p9 = scmp.lt.s32.totalorder %s1305_s19, %s1298_s9 }
  0x4a   : > { %p1302_p0 = pneg %p1301_p11  ;;  %p1308_p1 = por %p1307_p9, %p1306_p5 }
  0x4c   : > { %p1309_p2 = pnand %p1308_p1, %p1302_p0 }
  0x4e   : > { %1312 = shalt.err (!%p1309_p2)
}
  0x4f   : > { %1175 = dma.hbm_to_vmem [thread:$0]  (!%p1628_p13), %s1622_s12, 128, %s1624_s28, %s252_s14  }
  0x50   : > { %p1927_p7 = scmp.ne.s32.totalorder %s1920_s7, 0 }
  0x51   : > { %s1660_s3 = sand.u32 (!%p1927_p7), 1, %s1443_s22   ;;  %p1928_p3 = scmp.ne.s32.totalorder (!%p1927_p7), %s1918_s29, 0 }
  0x52   : > { %272 = sbr.rel (%p1927_p7) target bundleno = 923 (0x39b), region = 36  ;;  %s1115_s20 = sshll.u32 (!%p1927_p7), %s1660_s3, 3 }
  0x53   : > { %s275_s15 = scalar_lea.sflag (!%p1927_p7), [#allocation3], %s1660_s3  ;;  %s278_s8 = scalar_lea.vmem (!%p1927_p7), [#allocation2], %s1115_s20 }
  0x59   : > { %1422 = dma.done.wait (%p1928_p3), %s275_s15, 128  }
  0x5a   : > { %1424 = vsyncadd (%p1928_p3), %s275_s15, 4294967168  ;;  %p1929_p4 = scmp.eq.s32.totalorder %s1544_s27, 0 }
  0x5c   : > { %1426 = dma.done.wait (%p1929_p4), [#allocation6], 256   ;;  %p1930_p13 = pmov %p1929_p4 }
  0x5d   : > { %vm325_vm0 = vcmask 261120   ;;  %v322_v0 = vld [vmem:[%s278_s8] sm:$0xff]  ;;  %v1251_v7 = vld [vmem:[#allocation5] sm:$0xff]   ;;  %v1465_v8 = vmov 0.0   ;;  %vm1466_vm1 = vmmov 0   ;;  %v1252_v9 = vld [vmem:[#allocation5 + $0x8] sm:$0xff]   ;;  %v430_v31 = vlaneseq }
  0x5e   : > { %1428 = vsyncadd (%p1930_p13), [#allocation6], 4294967040  ;;  %v326_v1 = vsel %vm325_vm0, %v322_v0, 0.0  ;;  %1148 = vmatprep.subr.bf16.mxu0 %v1465_v8  ;;  %1152 = vmatprep.mubr.msk.bf16.mxu0 %vm1466_vm1, %v1465_v8  ;;  %v1120_v14 = vld [vmem:[%s1907_s1] ss:$0 sm:$0xff]  ;;  %s1467_s10 = smov 104  }
  0x5f   : > { %327 = vadd.xlane.f32.xlu0 %v326_v1  ;;  %1149 = vmatpush3.bf16.msra.mxu0 %v1251_v7  ;;  %v1121_v16 = vld [vmem:[%s1908_s2] ss:$0 sm:$0xff]  ;;  %s1468_s14 = smov 120   ;;  %s1469_s9 = smov 112   ;;  %v1472_v29 = vmov 1983009808  }
  0x60   : > { %1150 = vmatprep.subr.bf16.mxu0 %v1465_v8  ;;  %s1470_s13 = smov 96   ;;  %s1471_s17 = smov 64   ;;  %v428_v30 = vunpack.c.l.s4 %v1472_v29  ;;  %v1473_v33 = vmov 1934713408   ;;  %v431_v36 = vshrl.u32 %v430_v31, 7  ;;  %vm565_vm2 = vcmask 60416  }
  0x61   : > { %v460_v34 = vunpack.c.l.s4 %v1473_v33  ;;  %s1706_s19 = sshll.u32 %s1660_s3, 4  ;;  %s1713_s20 = sshll.u32 %s1451_s24, 8 }
  0x62   : > { %v429_v35 = vunpack.c.0.s8 %v428_v30  ;;  %s306_s15 = scalar_lea.vmem [#allocation7], %s1706_s19  ;;  %s1720_s7 = scalar_lea.hbm %s1910_s4, %s1713_s20 }
  0x63   : > { %1151 = vmatpush3.bf16.msra.mxu0 %v1252_v9  ;;  %v461_v39 = vunpack.c.0.s8 %v460_v34  ;;  %s914_s8 = sshll.u32 %s306_s15, 4  ;;  %s890_s24 = scalar_lea.sflag [#allocation4], %s1660_s3  ;;  %s1722_s8 = int_to_ptr.vmem [resolvable:$true] %s914_s8 }
  0x64   : > { %v1689_v40 = vsub.s32 %v429_v35, %v431_v36  ;;  %s1313_s12 = scalar_lea.vmem %s1722_s8, 256 }
  0x65   : > { %v1691_v46 = vsub.s32 %v461_v39, %v431_v36  ;;  %p1314_p6 = scmp.ne.s32.totalorder %s1722_s8, %s1313_s12 }
  0x67   : > { %p1315_p8 = pnand %p1314_p6, %p1607_p10 }
  0x69   : > { %p1316_p12 = pneg %p1315_p8 }
  0xec   : > { %v328_v2 = vpop.xlane.xlu0 %327 }
  0xed   : > { %v330_v3 = vmul.f32 0.03125, %v328_v2 }
  0xef   : > { %v331_v4 = vsub.f32 %v322_v0, %v330_v3 }
  0xf1   : > { %v332_v5 = vmul.f32 %v331_v4, %v331_v4 }
  0xf3   : > { %v333_v6 = vsel %vm325_vm0, %v332_v5, 0.0 }
  0xf4   : > { %334 = vadd.xlane.f32.xlu0 %v333_v6 }
 0x181   : > { %v335_v10 = vpop.xlane.xlu0 %334 }
 0x182   : > { %v336_v11 = vmul.f32 0.03125, %v335_v10 }
 0x184   : > { %v337_v12 = vadd.f32 1e-05, %v336_v11 }
 0x186   : > { %1253 = vrsqrt.f32 %v337_v12 }
 0x190   : > { %v1254_v13 = vpop.eup %1253 }
 0x191   : > { %v339_v15 = vmul.f32 %v1254_v13, %v331_v4 }
 0x193   : > { %v346_v17 = vmul.f32 %v1120_v14, %v339_v15 }
 0x195   : > { %v353_v18 = vadd.f32 %v1121_v16, %v346_v17 }
 0x197   : > { %v354_v19 = vpack.c.bf16 %v353_v18, %v353_v18 }
 0x199   : > { %1153 = vmatmul.mubr.msk.bf16.vlgmr.msra.gmra.mrb[0].mxu0 %vm325_vm0, %v354_v19 }
 0x26c   : > { %v408_v20 = vpop.f32.mrb[0].mxu0 }
 0x26d   : > { %575 = vrot.lane.b32.xlu0 %v408_v20, %s1467_s10  ;;  %571 = vrot.lane.b32.xlu1 %v408_v20, %s1468_s14  ;;  %v1154_v21 = vpop.f32.mrb[1].mxu0  ;;  %v414_v23 = vmul.f32 0.35355338, %v408_v20 }
 0x26e   : > { %v411_v22 = vpop.f32.mrb[2].mxu0 }
 0x26f   : > { %v1155_v24 = vpop.f32.mrb[3].mxu0 }
 0x271   : > { %573 = vrot.lane.b32.xlu1 %v408_v20, %s1469_s9  ;;  %422 = vrot.lane.b32.xlu0 %v414_v23, %s1467_s10  ;;  %s1474_s10 = smov [#allocation7]  }
 0x275   : > { %577 = vrot.lane.b32.xlu1 %v408_v20, %s1470_s13 }
 0x279   : > { %733 = vrot.lane.b32.xlu1 %v408_v20, %s1471_s17 }
 0x27d   : > { %416 = vrot.lane.b32.xlu1 %v414_v23, %s1468_s14  ;;  %s1317_s14 = sshll.u32 %s1474_s10, 4  ;;  %s1318_s14 = int_to_ptr.vmem [resolvable:$false] %s1317_s14 }
 0x27e   : > { %p1320_p11 = scmp.lt.s32.totalorder %s1722_s8, %s1318_s14 }
 0x281   : > { %419 = vrot.lane.b32.xlu1 %v414_v23, %s1469_s9  ;;  %s1319_s9 = scalar_lea.vmem %s1318_s14, 512 }
 0x282   : > { %p1321_p0 = scmp.lt.s32.totalorder %s1319_s9, %s1313_s12 }
 0x284   : > { %p1322_p5 = por %p1321_p0, %p1320_p11 }
 0x286   : > { %p1323_p9 = pnand %p1322_p5, %p1316_p12 }
 0x2df   : > { %v572_v25 = vpop.permute.xlu1 %571  ;;  %v576_v26 = vpop.permute.xlu0 %575 }
 0x2e0   : > { %735 = vrot.lane.b32.xlu0 %v572_v25, %s1471_s17  ;;  %579 = vrot.lane.b32.xlu1 %v572_v25, %s1470_s13 }
 0x2e3   : > { %v574_v27 = vpop.permute.xlu1 %573  ;;  %v423_v38 = vpop.permute.xlu0 %422 }
 0x2e4   : > { %739 = vrot.lane.b32.xlu0 %v576_v26, %s1471_s17  ;;  %581 = vrot.lane.b32.xlu1 %v574_v27, %s1470_s13 }
 0x2e7   : > { %v1684_v28 = vpop.permute.xlu1 %577 }
 0x2e8   : > { %583 = vrot.lane.b32.xlu1 %v576_v26, %s1470_s13 }
 0x2eb   : > { %v1686_v32 = vpop.permute.xlu1 %733 }
 0x2ec   : > { %737 = vrot.lane.b32.xlu1 %v574_v27, %s1471_s17 }
 0x2ef   : > { %v417_v37 = vpop.permute.xlu1 %416 }
 0x2f0   : > { %v441_v41 = vcombine.low %v417_v37, %v423_v38  ;;  %v442_v42 = vcombine.high %v417_v37, %v423_v38 }
 0x2f2   : > { %v449_v47 = vrot.slane %v441_v41, %v1689_v40  ;;  %v456_v48 = vrot.slane %v442_v42, %v1689_v40 }
 0x2f3   : > { %v420_v43 = vpop.permute.xlu1 %419 }
 0x2f4   : > { %v425_v44 = vcombine.low %v414_v23, %v420_v43  ;;  %v426_v45 = vcombine.high %v414_v23, %v420_v43 }
 0x2f6   : > { %v433_v49 = vrot.slane %v425_v44, %v1689_v40  ;;  %v440_v50 = vrot.slane %v426_v45, %v1689_v40 }
 0x2f8   : > { %v457_v51 = vcombine.low %v433_v49, %v449_v47  ;;  %v458_v52 = vcombine.high %v433_v49, %v449_v47  ;;  %v473_v53 = vcombine.low %v440_v50, %v456_v48  ;;  %v474_v54 = vcombine.high %v440_v50, %v456_v48 }
 0x2fa   : > { %v465_v55 = vrot.slane %v457_v51, %v1691_v46  ;;  %v472_v56 = vrot.slane %v458_v52, %v1691_v46  ;;  %v481_v57 = vrot.slane %v473_v53, %v1691_v46  ;;  %v488_v58 = vrot.slane %v474_v54, %v1691_v46 }
 0x2fc   : > { %v493_v59 = vcombine.low %v465_v55, %v472_v56  ;;  %v1125_v60 = vcombine.high %v465_v55, %v472_v56  ;;  %v509_v61 = vcombine.low %v481_v57, %v488_v58  ;;  %v1126_v62 = vcombine.high %v481_v57, %v488_v58 }
 0x2fe   : > { %v500_v63 = vrot.slane %v493_v59, %v1689_v40  ;;  %v508_v0 = vrot.slane %v1125_v60, %v1689_v40  ;;  %v516_v1 = vrot.slane %v509_v61, %v1689_v40  ;;  %v524_v2 = vrot.slane %v1126_v62, %v1689_v40 }
 0x300   : > { %v525_v3 = vcombine.low %v500_v63, %v508_v0  ;;  %v526_v4 = vcombine.high %v500_v63, %v508_v0  ;;  %v541_v5 = vcombine.low %v516_v1, %v524_v2  ;;  %v542_v6 = vcombine.high %v516_v1, %v524_v2 }
 0x302   : > { %v533_v7 = vrot.slane %v525_v3, %v1691_v46  ;;  %v540_v8 = vrot.slane %v526_v4, %v1691_v46  ;;  %v549_v9 = vrot.slane %v541_v5, %v1691_v46  ;;  %v556_v10 = vrot.slane %v542_v6, %v1691_v46 }
 0x304   : > { %v557_v11 = vcombine.low %v533_v7, %v549_v9  ;;  %v558_v12 = vcombine.high %v533_v7, %v549_v9  ;;  %v559_v13 = vcombine.low %v540_v8, %v556_v10  ;;  %v560_v14 = vcombine.high %v540_v8, %v556_v10 }
 0x306   : > { %v561_v15 = vpack.c.bf16 %v557_v11, %v557_v11  ;;  %v562_v16 = vpack.c.bf16 %v558_v12, %v558_v12  ;;  %v563_v17 = vpack.c.bf16 %v559_v13, %v559_v13  ;;  %v564_v18 = vpack.c.bf16 %v560_v14, %v560_v14 }
 0x308   : > { %566 = vst.msk [vmem:[%s306_s15] sm:$0xf] %vm565_vm2, %v561_v15  ;;  %567 = vst.msk [vmem:[%s306_s15 + $0x4] sm:$0xf] %vm565_vm2, %v562_v16 }
 0x309   : > { %568 = vst.msk [vmem:[%s306_s15 + $0x8] sm:$0xf] %vm565_vm2, %v563_v17  ;;  %569 = vst.msk [vmem:[%s306_s15 + $0xc] sm:$0xf] %vm565_vm2, %v564_v18 }
 0x30a   : > { %1326 = shalt.err (!%p1323_p9)
}
 0x30b   : > { %s1327_s13 = scalar_lea.hbm %s1720_s7, 256  ;;  %s1331_s29 = scalar_lea.hbm %s1910_s4, 512 }
 0x30c   : > { %p1328_p1 = scmp.ne.s32.totalorder %s1720_s7, %s1327_s13  ;;  %p1332_p3 = scmp.lt.u32.totalorder %s1720_s7, %s1910_s4 }
 0x30d   : > { %p1333_p4 = scmp.lt.u32.totalorder %s1331_s29, %s1327_s13  ;;  %p1335_p6 = scmp.lt.u32.totalorder %s1327_s13, %s1720_s7 }
 0x30e   : > { %p1329_p2 = pnand %p1328_p1, %p1607_p10 }
 0x30f   : > { %p1334_p13 = por %p1333_p4, %p1332_p3 }
 0x310   : > { %p1330_p7 = pneg %p1329_p2 }
 0x311   : > { %p1336_p8 = por %p1335_p6, %p1334_p13 }
 0x313   : > { %p1337_p12 = pnand %p1336_p8, %p1330_p7 }
 0x315   : > { %1340 = shalt.err (!%p1337_p12)
}
 0x316   : > { %s1475_s12 = smov 4   ;;  %s894_s3 = sand.u32 1, %s1544_s27  }
 0x317   : > { %1162 = dma.vmem_to_hbm [thread:$0]  (%p1607_p10), %s1722_s8, 256, %s1720_s7, %s890_s24, %s1471_s17, %s1471_s17, %s1475_s12  }
 0x318   : > { %s313_s8 = scalar_lea.vmem [#allocation8], %s1706_s19  ;;  %s1793_s13 = scalar_lea.hbm %s1911_s5, %s1713_s20 }
 0x319   : > { %s931_s7 = sshll.u32 %s313_s8, 4  ;;  %s1806_s15 = scalar_lea.vmem [#allocation10], %s1706_s19  ;;  %s1795_s7 = int_to_ptr.vmem [resolvable:$true] %s931_s7 }
 0x31a   : > { %s948_s28 = sshll.u32 %s1806_s15, 4  ;;  %s1811_s29 = scalar_lea.sflag [#allocation9], %s894_s3  ;;  %s1846_s28 = int_to_ptr.vmem [resolvable:$true] %s948_s28 }
 0x31b   : > { %s1341_s10 = scalar_lea.vmem %s1795_s7, 256  ;;  %s1476_s14 = smov [#allocation8]  }
 0x31c   : > { %p1342_p11 = scmp.ne.s32.totalorder %s1795_s7, %s1341_s10  ;;  %s1345_s24 = sshll.u32 %s1476_s14, 4  ;;  %s1346_s24 = int_to_ptr.vmem [resolvable:$false] %s1345_s24 }
 0x31d   : > { %p1348_p9 = scmp.lt.s32.totalorder %s1795_s7, %s1346_s24 }
 0x31e   : > { %p1343_p0 = pnand %p1342_p11, %p1607_p10 }
 0x320   : > { %p1344_p5 = pneg %p1343_p0 }
 0x352   : > { %v580_v19 = vpop.permute.xlu1 %579  ;;  %v736_v20 = vpop.permute.xlu0 %735 }
 0x356   : > { %v582_v21 = vpop.permute.xlu1 %581  ;;  %v740_v25 = vpop.permute.xlu0 %739 }
 0x357   : > { %v589_v22 = vcombine.low %v1684_v28, %v582_v21  ;;  %v590_v23 = vcombine.high %v1684_v28, %v582_v21  ;;  %v761_v34 = vcombine.low %v736_v20, %v740_v25  ;;  %v762_v35 = vcombine.high %v736_v20, %v740_v25 }
 0x359   : > { %v597_v29 = vrot.slane %v589_v22, %v1689_v40  ;;  %v604_v30 = vrot.slane %v590_v23, %v1689_v40  ;;  %v769_v48 = vrot.slane %v761_v34, %v1689_v40  ;;  %v776_v49 = vrot.slane %v762_v35, %v1689_v40 }
 0x35a   : > { %v584_v24 = vpop.permute.xlu1 %583 }
 0x35b   : > { %v605_v26 = vcombine.low %v580_v19, %v584_v24  ;;  %v606_v27 = vcombine.high %v580_v19, %v584_v24 }
 0x35d   : > { %v613_v31 = vrot.slane %v605_v26, %v1689_v40  ;;  %v620_v33 = vrot.slane %v606_v27, %v1689_v40 }
 0x35e   : > { %v738_v36 = vpop.permute.xlu1 %737 }
 0x35f   : > { %v621_v37 = vcombine.low %v597_v29, %v613_v31  ;;  %v622_v38 = vcombine.high %v597_v29, %v613_v31  ;;  %v637_v39 = vcombine.low %v604_v30, %v620_v33  ;;  %v638_v41 = vcombine.high %v604_v30, %v620_v33 }
 0x360   : > { %v745_v28 = vcombine.low %v1686_v32, %v738_v36  ;;  %v746_v42 = vcombine.high %v1686_v32, %v738_v36 }
 0x361   : > { %v629_v43 = vrot.slane %v621_v37, %v1691_v46  ;;  %v636_v44 = vrot.slane %v622_v38, %v1691_v46  ;;  %v645_v45 = vrot.slane %v637_v39, %v1691_v46  ;;  %v652_v47 = vrot.slane %v638_v41, %v1691_v46 }
 0x362   : > { %v753_v50 = vrot.slane %v745_v28, %v1689_v40  ;;  %v760_v51 = vrot.slane %v746_v42, %v1689_v40 }
 0x363   : > { %v657_v52 = vcombine.low %v629_v43, %v636_v44  ;;  %v1127_v53 = vcombine.high %v629_v43, %v636_v44  ;;  %v673_v54 = vcombine.low %v645_v45, %v652_v47  ;;  %v1128_v32 = vcombine.high %v645_v45, %v652_v47 }
 0x364   : > { %v777_v55 = vcombine.low %v753_v50, %v769_v48  ;;  %v778_v56 = vcombine.high %v753_v50, %v769_v48  ;;  %v793_v57 = vcombine.low %v760_v51, %v776_v49  ;;  %v794_v58 = vcombine.high %v760_v51, %v776_v49 }
 0x365   : > { %v664_v59 = vrot.slane %v657_v52, %v1689_v40  ;;  %v672_v60 = vrot.slane %v1127_v53, %v1689_v40  ;;  %v680_v61 = vrot.slane %v673_v54, %v1689_v40  ;;  %v688_v62 = vrot.slane %v1128_v32, %v1689_v40 }
 0x366   : > { %v785_v63 = vrot.slane %v777_v55, %v1691_v46  ;;  %v792_v0 = vrot.slane %v778_v56, %v1691_v46  ;;  %v801_v1 = vrot.slane %v793_v57, %v1691_v46  ;;  %v808_v2 = vrot.slane %v794_v58, %v1691_v46 }
 0x367   : > { %v689_v3 = vcombine.low %v664_v59, %v672_v60  ;;  %v690_v4 = vcombine.high %v664_v59, %v672_v60  ;;  %v705_v5 = vcombine.low %v680_v61, %v688_v62  ;;  %v706_v6 = vcombine.high %v680_v61, %v688_v62 }
 0x368   : > { %v813_v7 = vcombine.low %v785_v63, %v792_v0  ;;  %v1129_v8 = vcombine.high %v785_v63, %v792_v0  ;;  %v829_v9 = vcombine.low %v801_v1, %v808_v2  ;;  %v1130_v10 = vcombine.high %v801_v1, %v808_v2 }
 0x369   : > { %v697_v11 = vrot.slane %v689_v3, %v1691_v46  ;;  %v704_v12 = vrot.slane %v690_v4, %v1691_v46  ;;  %v713_v13 = vrot.slane %v705_v5, %v1691_v46  ;;  %v720_v14 = vrot.slane %v706_v6, %v1691_v46 }
 0x36a   : > { %v820_v15 = vrot.slane %v813_v7, %v1689_v40  ;;  %v828_v16 = vrot.slane %v1129_v8, %v1689_v40  ;;  %v836_v17 = vrot.slane %v829_v9, %v1689_v40  ;;  %v844_v18 = vrot.slane %v1130_v10, %v1689_v40 }
 0x36b   : > { %v721_v19 = vcombine.low %v697_v11, %v713_v13  ;;  %v722_v20 = vcombine.high %v697_v11, %v713_v13  ;;  %v723_v21 = vcombine.low %v704_v12, %v720_v14  ;;  %v724_v22 = vcombine.high %v704_v12, %v720_v14 }
 0x36c   : > { %v845_v23 = vcombine.low %v820_v15, %v828_v16  ;;  %v846_v24 = vcombine.high %v820_v15, %v828_v16  ;;  %v861_v25 = vcombine.low %v836_v17, %v844_v18  ;;  %v862_v26 = vcombine.high %v836_v17, %v844_v18 }
 0x36d   : > { %v725_v27 = vpack.c.bf16 %v721_v19, %v721_v19  ;;  %v726_v29 = vpack.c.bf16 %v722_v20, %v722_v20  ;;  %v727_v30 = vpack.c.bf16 %v723_v21, %v723_v21  ;;  %v728_v31 = vpack.c.bf16 %v724_v22, %v724_v22 }
 0x36e   : > { %v853_v40 = vrot.slane %v845_v23, %v1691_v46  ;;  %v860_v33 = vrot.slane %v846_v24, %v1691_v46  ;;  %v869_v34 = vrot.slane %v861_v25, %v1691_v46  ;;  %v876_v35 = vrot.slane %v862_v26, %v1691_v46 }
 0x36f   : > { %729 = vst.msk [vmem:[%s313_s8] sm:$0xf] %vm565_vm2, %v725_v27  ;;  %730 = vst.msk [vmem:[%s313_s8 + $0x4] sm:$0xf] %vm565_vm2, %v726_v29 }
 0x370   : > { %731 = vst.msk [vmem:[%s313_s8 + $0x8] sm:$0xf] %vm565_vm2, %v727_v30  ;;  %732 = vst.msk [vmem:[%s313_s8 + $0xc] sm:$0xf] %vm565_vm2, %v728_v31  ;;  %v877_v36 = vcombine.low %v853_v40, %v869_v34  ;;  %v878_v37 = vcombine.high %v853_v40, %v869_v34  ;;  %v879_v38 = vcombine.low %v860_v33, %v876_v35  ;;  %s1347_s8 = scalar_lea.vmem %s1346_s24, 512 }
 0x371   : > { %v880_v39 = vcombine.high %v860_v33, %v876_v35  ;;  %p1349_p1 = scmp.lt.s32.totalorder %s1347_s8, %s1341_s10 }
 0x373   : > { %p1350_p2 = por %p1349_p1, %p1348_p9 }
 0x375   : > { %p1351_p7 = pnand %p1350_p2, %p1344_p5 }
 0x377   : > { %1354 = shalt.err (!%p1351_p7)
}
 0x378   : > { %s1355_s27 = scalar_lea.hbm %s1793_s13, 256  ;;  %s1359_s9 = scalar_lea.hbm %s1911_s5, 512 }
 0x379   : > { %p1356_p3 = scmp.ne.s32.totalorder %s1793_s13, %s1355_s27  ;;  %p1360_p6 = scmp.lt.u32.totalorder %s1793_s13, %s1911_s5 }
 0x37a   : > { %p1361_p8 = scmp.lt.u32.totalorder %s1359_s9, %s1355_s27  ;;  %p1363_p11 = scmp.lt.u32.totalorder %s1355_s27, %s1793_s13 }
 0x37b   : > { %p1357_p4 = pnand %p1356_p3, %p1607_p10 }
 0x37c   : > { %p1362_p12 = por %p1361_p8, %p1360_p6 }
 0x37d   : > { %p1358_p13 = pneg %p1357_p4 }
 0x37e   : > { %p1364_p0 = por %p1363_p11, %p1362_p12 }
 0x380   : > { %p1365_p5 = pnand %p1364_p0, %p1358_p13 }
 0x382   : > { %1368 = shalt.err (!%p1365_p5)
}
 0x383   : > { %1163 = dma.vmem_to_hbm [thread:$0]  (%p1607_p10), %s1795_s7, 256, %s1793_s13, %s1811_s29, %s1471_s17, %s1471_s17, %s1475_s12   ;;  %v881_v46 = vpack.c.bf16 %v877_v36, %v877_v36  ;;  %v882_v41 = vpack.c.bf16 %v878_v37, %v878_v37  ;;  %v883_v28 = vpack.c.bf16 %v879_v38, %v879_v38  ;;  %v884_v42 = vpack.c.bf16 %v880_v39, %v880_v39 }
 0x384   : > { %s1842_s27 = scalar_lea.hbm %s1912_s6, %s1713_s20  ;;  %s1369_s7 = scalar_lea.vmem %s1846_s28, 256 }
 0x385   : > { %885 = vst.msk [vmem:[%s1806_s15] sm:$0xf] %vm565_vm2, %v881_v46  ;;  %886 = vst.msk [vmem:[%s1806_s15 + $0x4] sm:$0xf] %vm565_vm2, %v882_v41  ;;  %p1370_p9 = scmp.ne.s32.totalorder %s1846_s28, %s1369_s7  ;;  %s1477_s20 = smov [#allocation10]  }
 0x386   : > { %887 = vst.msk [vmem:[%s1806_s15 + $0x8] sm:$0xf] %vm565_vm2, %v883_v28  ;;  %888 = vst.msk [vmem:[%s1806_s15 + $0xc] sm:$0xf] %vm565_vm2, %v884_v42  ;;  %s1373_s13 = sshll.u32 %s1477_s20, 4  ;;  %s1374_s13 = int_to_ptr.vmem [resolvable:$false] %s1373_s13 }
 0x387   : > { %p1371_p1 = pnand %p1370_p9, %p1607_p10  ;;  %s1375_s19 = scalar_lea.vmem %s1374_s13, 512 }
 0x388   : > { %p1376_p7 = scmp.lt.s32.totalorder %s1846_s28, %s1374_s13  ;;  %p1377_p3 = scmp.lt.s32.totalorder %s1375_s19, %s1369_s7 }
 0x389   : > { %p1372_p2 = pneg %p1371_p1 }
 0x38a   : > { %p1378_p4 = por %p1377_p3, %p1376_p7 }
 0x38c   : > { %p1379_p13 = pnand %p1378_p4, %p1372_p2 }
 0x38e   : > { %1382 = shalt.err (!%p1379_p13)
}
 0x38f   : > { %s1383_s15 = scalar_lea.hbm %s1842_s27, 256  ;;  %s1387_s14 = scalar_lea.hbm %s1912_s6, 512 }
 0x390   : > { %p1384_p6 = scmp.ne.s32.totalorder %s1842_s27, %s1383_s15  ;;  %p1388_p11 = scmp.lt.u32.totalorder %s1842_s27, %s1912_s6 }
 0x391   : > { %p1389_p0 = scmp.lt.u32.totalorder %s1387_s14, %s1383_s15  ;;  %p1391_p9 = scmp.lt.u32.totalorder %s1383_s15, %s1842_s27 }
 0x392   : > { %p1385_p8 = pnand %p1384_p6, %p1607_p10 }
 0x393   : > { %p1390_p5 = por %p1389_p0, %p1388_p11 }
 0x394   : > { %p1386_p12 = pneg %p1385_p8 }
 0x395   : > { %p1392_p1 = por %p1391_p9, %p1390_p5 }
 0x397   : > { %p1393_p2 = pnand %p1392_p1, %p1386_p12 }
 0x399   : > { %1396 = shalt.err (!%p1393_p2)
}
 0x39a   : > { %1164 = dma.vmem_to_hbm [thread:$0]  (%p1607_p10), %s1846_s28, 256, %s1842_s27, %s1811_s29, %s1471_s17, %s1471_s17, %s1475_s12  }
 0x39b PF: > { %s963_s8 = sand.u32 1, %s1439_s21   ;;  %p1931_p7 = scmp.ne.s32.totalorder %s1919_s30, 0 }
 0x39c   : > { %p1932_p3 = scmp.ge.s32.totalorder %s1459_s26, 2  ;;  %s964_s7 = scalar_lea.sflag [#allocation4], %s963_s8 }
 0x39e   : > { %p1177_p4 = pnand %p1932_p3, %p1931_p7 }
 0x3a0   : > { %1430 = dma.done.wait (!%p1177_p4), %s964_s7, 256  }
 0x3a1   : > { %1432 = vsyncadd (!%p1177_p4), %s964_s7, 4294967040  ;;  %s1933_s16 = sadd.s32 4294967294, %s1459_s26  }
 0x3a2   : > { %s972_s20 = sand.u32 1, %s1933_s16  }
 0x3a3   : > { %s973_s13 = scalar_lea.sflag [#allocation9], %s972_s20 }
 0x3a4   : > { %1434 = dma.done.wait (!%p1177_p4), %s973_s13, 512  }
 0x3a5   : > { %1436 = vsyncadd (!%p1177_p4), %s973_s13, 4294966784  ;;  %s27_s26 = sadd.s32 1, %s1459_s26   ;;  %s1934_s21 = smov %s1443_s22 }
 0x3a6   : > { %p24_p10 = scmp.ge.s32.totalorder %s27_s26, 4   ;;  %s1935_s22 = smov %s1447_s23 }
 0x3a7   : > { %s1936_s23 = smov %s1616_s18  ;;  %s1937_s24 = smov %s1455_s25 }
 0x3a8   : > { %s1938_s25 = smov %s1940_s11  ;;  %26 = sbr.rel (!%p24_p10) target bundleno = 11 (0xb), region = 117 }
 0x3af   :  { %987 = vsyncpa [#allocation3], 1 }
 0x3b0   :  { %989 = vsyncpa [#allocation3 + $0x1], 1 }
 0x3b1   :  { %990 = vsyncpa [#allocation6], 1 }
 0x3b2   :  { %991 = vsyncpa [#allocation4], 1 }
 0x3b3   :  { %993 = vsyncpa [#allocation4 + $0x1], 1 }
 0x3b4   :  { %994 = vsyncpa [#allocation9], 1 }
 0x3b5   :  { %996 = vsyncpa [#allocation9 + $0x1], 1 }

</bundles_post_ra>
